<compile_context>
chip_gen: v7x
topology: tpu7x:2x2x1
jax: 0.10.0
libtpu: 0.0.40
codegen_flags: <defaults>
</compile_context>

<pallas_src>
import jax
import jax.numpy as jnp
from jax.experimental import pallas as pl
from jax.experimental.pallas import tpu as pltpu


# --------------------------------------------------------------------------
# Kernels
# --------------------------------------------------------------------------


def _ffn_kernel_resident(x_ref, w1_ref, b1_ref, w2_ref, b2_ref, o_ref):
    """Weights fully VMEM-resident; one pass per token block, no scratch."""
    # Bias add / ReLU stay in f32 (cheap VPU work; v5e has no bf16 VALU).
    h = jnp.dot(x_ref[...], w1_ref[...], preferred_element_type=jnp.float32)
    h = jnp.maximum(h + b1_ref[...], 0.0)                        # (tm, H) f32
    out = jnp.dot(h.astype(w2_ref.dtype), w2_ref[...],
                  preferred_element_type=jnp.float32)
    o_ref[...] = (out + b2_ref[...]).astype(o_ref.dtype)


def _ffn_kernel_streamed(x_ref, w1_ref, b1_ref, w2_ref, b2_ref, o_ref, acc_ref):
    """Hidden (H) axis streamed as the trailing reduction grid axis."""
    k = pl.program_id(1)

    @pl.when(k == 0)
    def _init():
        acc_ref[...] = jnp.zeros_like(acc_ref)

    h = jnp.dot(x_ref[...], w1_ref[...], preferred_element_type=jnp.float32)
    h = jnp.maximum(h + b1_ref[...], 0.0)                        # (tm, th) f32
    acc_ref[...] += jnp.dot(h.astype(w2_ref.dtype), w2_ref[...],
                            preferred_element_type=jnp.float32)

    @pl.when(k == pl.num_programs(1) - 1)
    def _finalize():
        # b2 added exactly once, outside the accumulate loop.
        o_ref[...] = (acc_ref[...] + b2_ref[...]).astype(o_ref.dtype)


# --------------------------------------------------------------------------
# Wrapper
# --------------------------------------------------------------------------


def _vmem_budget_bytes():
    """~75% of physical VMEM: leaves headroom for compiler scratch / spills."""
    cap = 64 * 1024 * 1024  # conservative default (v7x per-TensorCore VMEM)
    try:
        info = pltpu.get_tpu_info()
        cap = int(getattr(info, "vmem_capacity_bytes", cap) or cap)
    except Exception:
        pass
    return (cap * 3) // 4


def feed_forward(x, w1, b1, w2, b2, *, token_tile=None, hidden_tile=None,
                 compute_dtype=None):
    """x: (n_tokens, E); w1: (E, H); b1: (H,); w2: (H, E); b2: (E,)."""
    n_tokens, emb = x.shape
    hidden = w1.shape[1]
    assert w1.shape == (emb, hidden)
    assert b1.shape == (hidden,)
    assert w2.shape == (hidden, emb)
    assert b2.shape == (emb,)

    out_dtype = x.dtype
    if compute_dtype is not None:
        # Optional lower-precision MXU operands (f32 accumulation is kept via
        # preferred_element_type inside the kernels).
        x = x.astype(compute_dtype)
        w1 = w1.astype(compute_dtype)
        w2 = w2.astype(compute_dtype)
    itemsize = x.dtype.itemsize
    out_itemsize = jnp.dtype(out_dtype).itemsize

    # Keep biases 2-D (sublane, lane) and in f32 (they're added in f32).
    b1_2d = b1.reshape(1, hidden).astype(jnp.float32)
    b2_2d = b2.reshape(1, emb).astype(jnp.float32)

    budget = _vmem_budget_bytes()

    # ---- Token tile: prefer >= 2 blocks so v7x's two TensorCores both get
    # ---- work, and so x/out tiles pipeline against compute.
    if token_tile is not None:
        assert n_tokens % token_tile == 0
        tm_cands = [token_tile]
    else:
        divs = [c for c in (512, 256, 128, 64, 32, 16, 8)
                if c <= n_tokens and n_tokens % c == 0]
        if not divs:
            divs = [n_tokens]
        tm_cands = [c for c in divs if 2 * c <= n_tokens] or divs

    bias_bytes = 2 * 2 * (hidden + emb) * 4

    def resident_fp(tm):
        return (2 * 2 * emb * hidden * itemsize      # w1 + w2 (worst case 2 bufs)
                + 2 * 2 * tm * emb * itemsize        # x + out, double-buffered
                + tm * hidden * 4 + tm * emb * 4     # f32 intermediates
                + bias_bytes)

    def streamed_fp(tm, th):
        return (2 * (tm * emb + emb * th + th * emb) * itemsize  # dbl-buffered ins
                + 2 * tm * emb * itemsize                        # out
                + tm * emb * 4                                   # f32 accumulator
                + tm * th * 4                                    # f32 intermediate
                + bias_bytes)

    flops = 4 * n_tokens * emb * hidden
    weight_bytes = (w1.size + w2.size) * itemsize
    once_bytes = (x.size * itemsize + weight_bytes
                  + b1_2d.size * 4 + b2_2d.size * 4
                  + n_tokens * emb * out_itemsize)

    # ------------------------- Resident-weights fast path -------------------
    want_resident = hidden_tile is None or hidden_tile >= hidden
    if want_resident:
        for tm in tm_cands:
            if resident_fp(tm) > budget:
                continue
            grid = (n_tokens // tm,)
            cost = pl.CostEstimate(flops=flops, transcendentals=0,
                                   bytes_accessed=once_bytes)
            return pl.pallas_call(
                _ffn_kernel_resident,
                out_shape=jax.ShapeDtypeStruct((n_tokens, emb), out_dtype),
                grid_spec=pltpu.PrefetchScalarGridSpec(
                    num_scalar_prefetch=0,
                    grid=grid,
                    in_specs=[
                        pl.BlockSpec((tm, emb), lambda i: (i, 0)),      # x tile
                        pl.BlockSpec((emb, hidden), lambda i: (0, 0)),  # w1 resident
                        pl.BlockSpec((1, hidden), lambda i: (0, 0)),    # b1 resident
                        pl.BlockSpec((hidden, emb), lambda i: (0, 0)),  # w2 resident
                        pl.BlockSpec((1, emb), lambda i: (0, 0)),       # b2 resident
                    ],
                    out_specs=pl.BlockSpec((tm, emb), lambda i: (i, 0)),
                ),
                compiler_params=pltpu.CompilerParams(
                    dimension_semantics=("parallel",),
                    vmem_limit_bytes=budget,
                ),
                cost_estimate=cost,
            )(x, w1, b1_2d, w2, b2_2d)

    # ------------------------- Streamed-H fallback --------------------------
    if hidden_tile is not None:
        assert hidden % hidden_tile == 0
        th_cands = [hidden_tile]
    else:
        th_cands = [c for c in (1024, 512, 256, 128)
                    if c <= hidden and hidden % c == 0] or [hidden]

    tm, th = tm_cands[-1], th_cands[-1]
    found = False
    for cand_tm in tm_cands:
        for cand_th in th_cands:
            if streamed_fp(cand_tm, cand_th) <= budget:
                tm, th = cand_tm, cand_th
                found = True
                break
        if found:
            break
    # If nothing fits the budget we still run with the smallest candidates.

    grid = (n_tokens // tm, hidden // th)
    n_token_blocks = n_tokens // tm
    # Weights (and b1) are re-read once per token block in this scheme.
    bytes_accessed = (x.size * itemsize
                      + n_token_blocks * (weight_bytes + b1_2d.size * 4)
                      + b2_2d.size * 4
                      + n_tokens * emb * out_itemsize)
    cost = pl.CostEstimate(flops=flops, transcendentals=0,
                           bytes_accessed=bytes_accessed)

    return pl.pallas_call(
        _ffn_kernel_streamed,
        out_shape=jax.ShapeDtypeStruct((n_tokens, emb), out_dtype),
        grid_spec=pltpu.PrefetchScalarGridSpec(
            num_scalar_prefetch=0,
            grid=grid,
            in_specs=[
                pl.BlockSpec((tm, emb), lambda i, k: (i, 0)),   # x (const over k)
                pl.BlockSpec((emb, th), lambda i, k: (0, k)),   # w1 column tile
                pl.BlockSpec((1, th), lambda i, k: (0, k)),     # b1 slice
                pl.BlockSpec((th, emb), lambda i, k: (k, 0)),   # w2 row tile
                pl.BlockSpec((1, emb), lambda i, k: (0, 0)),    # b2 (tiny, resident)
            ],
            out_specs=pl.BlockSpec((tm, emb), lambda i, k: (i, 0)),
            scratch_shapes=[pltpu.VMEM((tm, emb), jnp.float32)],
        ),
        compiler_params=pltpu.CompilerParams(
            dimension_semantics=("parallel", "arbitrary"),
            vmem_limit_bytes=budget,
        ),
        cost_estimate=cost,
    )(x, w1, b1_2d, w2, b2_2d)


# TODO(synk): for embedding sizes that are not multiples of 128, pad the lane
# dim in the wrapper so output stores are unmasked (lane-dense) vst.


def _reference(x, w1, b1, w2, b2):
    return jnp.maximum(x @ w1 + b1, 0.0) @ w2 + b2


if __name__ == "__main__":
    key = jax.random.PRNGKey(0)

    # --- Small shapes consistent with the module's forward contract. --------
    n_tokens, embedding_size, ffn_inner_layer = 8, 32, 64
    kx, kw1, kb1, kw2, kb2, k_rest = jax.random.split(key, 6)

    x = jax.random.normal(kx, (n_tokens, embedding_size), jnp.float32)
    w1 = jax.random.normal(kw1, (embedding_size, ffn_inner_layer), jnp.float32) * 0.1
    b1 = jax.random.normal(kb1, (ffn_inner_layer,), jnp.float32) * 0.1
    w2 = jax.random.normal(kw2, (ffn_inner_layer, embedding_size), jnp.float32) * 0.1
    b2 = jax.random.normal(kb2, (embedding_size,), jnp.float32) * 0.1

    out = jax.block_until_ready(feed_forward(x, w1, b1, w2, b2))
    ref = _reference(x, w1, b1, w2, b2)
    assert out.shape == (n_tokens, embedding_size)
    assert jnp.allclose(out, ref, atol=1e-5, rtol=1e-5), "small-shape mismatch"

    # --- Modest shapes: resident fast path with 2 token blocks. -------------
    n_tokens2, emb2, hid2 = 512, 256, 1024
    ka, kb, kc, kd, ke = jax.random.split(k_rest, 5)
    x2 = jax.random.normal(ka, (n_tokens2, emb2), jnp.float32)
    w1b = jax.random.normal(kb, (emb2, hid2), jnp.float32) * 0.05
    b1b = jax.random.normal(kc, (hid2,), jnp.float32) * 0.05
    w2b = jax.random.normal(kd, (hid2, emb2), jnp.float32) * 0.05
    b2b = jax.random.normal(ke, (emb2,), jnp.float32) * 0.05

    ref2 = _reference(x2, w1b, b1b, w2b, b2b)

    out2 = jax.block_until_ready(feed_forward(x2, w1b, b1b, w2b, b2b))
    assert out2.shape == (n_tokens2, emb2)
    rel = float(jnp.max(jnp.abs(out2 - ref2)) / (jnp.max(jnp.abs(ref2)) + 1e-6))
    assert rel < 1e-3, f"resident-path mismatch, rel_err={rel}"

    # --- Force the streamed (H-split) fallback path and check it too. -------
    out3 = jax.block_until_ready(
        feed_forward(x2, w1b, b1b, w2b, b2b, token_tile=128, hidden_tile=256))
    rel3 = float(jnp.max(jnp.abs(out3 - ref2)) / (jnp.max(jnp.abs(ref2)) + 1e-6))
    assert rel3 < 1e-3, f"streamed-path mismatch, rel_err={rel3}"

    # --- bf16 operands (f32 accumulation), loose tolerance. -----------------
    out4 = jax.block_until_ready(
        feed_forward(x2, w1b, b1b, w2b, b2b, compute_dtype=jnp.bfloat16))
    rel4 = float(jnp.max(jnp.abs(out4 - ref2)) / (jnp.max(jnp.abs(ref2)) + 1e-6))
    assert rel4 < 5e-2, f"bf16-path mismatch, rel_err={rel4}"

    print("KERNEL_OK")
</pallas_src>

<mosaic_0001>
module attributes {stable_mosaic.version = 11 : i64} {
  func.func @_ffn_kernel_resident(%arg0: i32, %arg1: memref<8x32xf32, #tpu.memory_space<vmem>>, %arg2: memref<32x64xf32, #tpu.memory_space<vmem>>, %arg3: memref<1x64xf32, #tpu.memory_space<vmem>>, %arg4: memref<64x32xf32, #tpu.memory_space<vmem>>, %arg5: memref<1x32xf32, #tpu.memory_space<vmem>>, %arg6: memref<8x32xf32, #tpu.memory_space<vmem>>) attributes {dimension_semantics = [#tpu.dimension_semantics<parallel>], iteration_bounds = array<i64: 1>, scalar_prefetch = 0 : i64, scratch_operands = 0 : i64, tpu.core_type = #tpu.core_type<tc>, window_params = [{transform_indices = @transform_0, window_bounds = array<i64: 8, 32>}, {pipeline_mode = #tpu.pipeline_mode<synchronous>, transform_indices = @transform_1, window_bounds = array<i64: 32, 64>}, {pipeline_mode = #tpu.pipeline_mode<synchronous>, transform_indices = @transform_2, window_bounds = array<i64: 1, 64>}, {pipeline_mode = #tpu.pipeline_mode<synchronous>, transform_indices = @transform_3, window_bounds = array<i64: 64, 32>}, {pipeline_mode = #tpu.pipeline_mode<synchronous>, transform_indices = @transform_4, window_bounds = array<i64: 1, 32>}, {transform_indices = @transform_5, window_bounds = array<i64: 8, 32>}]} {
    %c0 = arith.constant 0 : index
    %c0_0 = arith.constant 0 : index
    %0 = vector.load %arg1[%c0, %c0_0] : memref<8x32xf32, #tpu.memory_space<vmem>>, vector<8x32xf32>
    %c0_1 = arith.constant 0 : index
    %c0_2 = arith.constant 0 : index
    %1 = vector.load %arg2[%c0_1, %c0_2] : memref<32x64xf32, #tpu.memory_space<vmem>>, vector<32x64xf32>
    %cst = arith.constant dense<0.000000e+00> : vector<8x64xf32>
    %2 = tpu.matmul %0, %1, %cst {dimension_numbers = #tpu.dot_dimension_numbers<[1], [0], [0], [1], [0, 0, 1, 1], [], []>} : vector<8x32xf32>, vector<32x64xf32>, vector<8x64xf32> -> vector<8x64xf32>
    %c0_3 = arith.constant 0 : index
    %c0_4 = arith.constant 0 : index
    %3 = vector.load %arg3[%c0_3, %c0_4] : memref<1x64xf32, #tpu.memory_space<vmem>>, vector<1x64xf32>
    %4 = vector.broadcast %3 : vector<1x64xf32> to vector<8x64xf32>
    %5 = arith.addf %2, %4 : vector<8x64xf32>
    %cst_5 = arith.constant 0.000000e+00 : f32
    %6 = vector.broadcast %cst_5 : f32 to vector<8x64xf32>
    %7 = arith.maximumf %5, %6 : vector<8x64xf32>
    %c0_6 = arith.constant 0 : index
    %c0_7 = arith.constant 0 : index
    %8 = vector.load %arg4[%c0_6, %c0_7] : memref<64x32xf32, #tpu.memory_space<vmem>>, vector<64x32xf32>
    %cst_8 = arith.constant dense<0.000000e+00> : vector<8x32xf32>
    %9 = tpu.matmul %7, %8, %cst_8 {dimension_numbers = #tpu.dot_dimension_numbers<[1], [0], [0], [1], [0, 0, 1, 1], [], []>} : vector<8x64xf32>, vector<64x32xf32>, vector<8x32xf32> -> vector<8x32xf32>
    %c0_9 = arith.constant 0 : index
    %c0_10 = arith.constant 0 : index
    %10 = vector.load %arg5[%c0_9, %c0_10] : memref<1x32xf32, #tpu.memory_space<vmem>>, vector<1x32xf32>
    %11 = vector.broadcast %10 : vector<1x32xf32> to vector<8x32xf32>
    %12 = arith.addf %9, %11 : vector<8x32xf32>
    %c0_11 = arith.constant 0 : index
    %c0_12 = arith.constant 0 : index
    %13 = vector.load %arg6[%c0_11, %c0_12] : memref<8x32xf32, #tpu.memory_space<vmem>>, vector<8x32xf32>
    tpu.vector_store %arg6[%c0_11, %c0_12], %12 {strides = array<i32>} : memref<8x32xf32, #tpu.memory_space<vmem>>, vector<8x32xf32>,
    return
  }
  func.func @transform_0(%arg0: i32) -> (i32, i32) {
    %c0_i32 = arith.constant 0 : i32
    %c0_i32_0 = arith.constant 0 : i32
    return %arg0, %c0_i32 : i32, i32
  }
  func.func @transform_1(%arg0: i32) -> (i32, i32) {
    %c0_i32 = arith.constant 0 : i32
    %c0_i32_0 = arith.constant 0 : i32
    %c0_i32_1 = arith.constant 0 : i32
    return %c0_i32, %c0_i32_0 : i32, i32
  }
  func.func @transform_2(%arg0: i32) -> (i32, i32) {
    %c0_i32 = arith.constant 0 : i32
    %c0_i32_0 = arith.constant 0 : i32
    %c0_i32_1 = arith.constant 0 : i32
    return %c0_i32, %c0_i32_0 : i32, i32
  }
  func.func @transform_3(%arg0: i32) -> (i32, i32) {
    %c0_i32 = arith.constant 0 : i32
    %c0_i32_0 = arith.constant 0 : i32
    %c0_i32_1 = arith.constant 0 : i32
    return %c0_i32, %c0_i32_0 : i32, i32
  }
  func.func @transform_4(%arg0: i32) -> (i32, i32) {
    %c0_i32 = arith.constant 0 : i32
    %c0_i32_0 = arith.constant 0 : i32
    %c0_i32_1 = arith.constant 0 : i32
    return %c0_i32, %c0_i32_0 : i32, i32
  }
  func.func @transform_5(%arg0: i32) -> (i32, i32) {
    %c0_i32 = arith.constant 0 : i32
    %c0_i32_0 = arith.constant 0 : i32
    return %arg0, %c0_i32 : i32, i32
  }
}

</mosaic_0001>

<bundles_post_ra>
// kernel: tpu_custom_call.1
= control target key start
LH: loop header
LB: loop body
LE: loop exit
PB: predicated region body
PF: predicated region fallthrough
CT: control target
= control target key end

     0   :  { %v306_v3 = vmov 0.0|0.0   ;;  %vm307_vm0 = vmmov 0   ;;  %v308_v6 = vmov 0.0   ;;  %s399_s0 = inlined_call_operand.vmem [shape: f32[8,32], index: 0, kind: input, shape index: {}]   ;;  %s400_s1 = inlined_call_operand.vmem [shape: f32[32,64], index: 1, kind: input, shape index: {}]   ;;  %s401_s2 = inlined_call_operand.vmem [shape: f32[1,64], index: 2, kind: input, shape index: {}]   ;;  %s402_s3 = inlined_call_operand.vmem [shape: f32[64,32], index: 3, kind: input, shape index: {}]   ;;  %s403_s4 = inlined_call_operand.vmem [shape: f32[1,32], index: 4, kind: input, shape index: {}]   ;;  %s404_s5 = inlined_call_operand.hbm [shape: f32[8,32], index: 5, kind: output, shape index: {}]  }
   0x1   :  { %v22_v0 = vld [vmem:[%s400_s1] sm:$0xff]  ;;  %v23_v1 = vld [vmem:[%s400_s1 + $0x8] sm:$0xff]  ;;  %v24_v2 = vld [vmem:[%s400_s1 + $0x10] sm:$0xff]  ;;  %260 = vmatprep.subr.bf16.mxu0 %v306_v3  ;;  %238 = vmatprep.mubr.msk.f32.mxu0 %vm307_vm0, %v308_v6 }
   0x2   :  { %v261_v4 = vpack.c.bf16 %v23_v1, %v22_v0  ;;  %v25_v5 = vld [vmem:[%s400_s1 + $0x18] sm:$0xff]  ;;  %v108_v7 = vld [vmem:[%s402_s3] sm:$0xff]  ;;  %266 = vmatprep.subr.bf16.mxu1 %v306_v3  ;;  %v109_v8 = vld [vmem:[%s402_s3 + $0x8] sm:$0xff]  ;;  %257 = vmatprep.mubr.msk.f32.mxu1 %vm307_vm0, %v308_v6 }
   0x3   :  { %v110_v9 = vld [vmem:[%s402_s3 + $0x10] sm:$0xff]  ;;  %v111_v10 = vld [vmem:[%s402_s3 + $0x18] sm:$0xff]  ;;  %v264_v11 = vpack.c.bf16 %v25_v5, %v24_v2  ;;  %v267_v12 = vpack.c.bf16 %v109_v8, %v108_v7 }
   0x4   :  { %262 = vmatpush3.bf16.msra.mxu0 %v261_v4 }
   0x5   :  { %263 = vmatprep.subr.bf16.mxu0 %v306_v3 }
   0x6   :  { %10 = vsyncpa [#allocation3], 0  ;;  %268 = vmatpush3.bf16.msra.mxu1 %v267_v12  ;;  %v270_v13 = vpack.c.bf16 %v111_v10, %v110_v9  ;;  %v112_v14 = vld [vmem:[%s402_s3 + $0x20] sm:$0xff]  ;;  %v113_v15 = vld [vmem:[%s402_s3 + $0x28] sm:$0xff]  ;;  %vm33_vm1 = vcmask 261120   ;;  %vm123_vm2 = vcmask 523264  }
   0x7   :  { %269 = vmatprep.subr.bf16.mxu1 %v306_v3  ;;  %v21_v16 = vld [vmem:[%s399_s0] sm:$0xff]  ;;  %v273_v17 = vpack.c.bf16 %v113_v15, %v112_v14  ;;  %v114_v18 = vld [vmem:[%s402_s3 + $0x30] sm:$0xff]  ;;  %v115_v19 = vld [vmem:[%s402_s3 + $0x38] sm:$0xff]  ;;  %s309_s21 = smov [#allocation2]  }
   0x8   :  { %265 = vmatpush3.bf16.msra.mxu0 %v264_v11  ;;  %v276_v20 = vpack.c.bf16 %v115_v19, %v114_v18  ;;  %v212_v21 = vld [vmem:[%s401_s2] ss:$0 sm:$0xff]  ;;  %s204_s22 = sshll.u32 %s309_s21, 4  ;;  %s205_s22 = int_to_ptr.vmem [resolvable:$true] %s204_s22 }
   0x9   :  { %v214_v26 = vld [vmem:[%s403_s4] ss:$0 sm:$0xff]  ;;  %s282_s3 = scalar_lea.vmem %s205_s22, 128  ;;  %p287_p1 = scmp.lt.s32.totalorder %s205_s22, %s205_s22 }
   0xa   :  { %271 = vmatpush3.bf16.msra.mxu1 %v270_v13  ;;  %p283_p0 = scmp.ne.s32.totalorder %s205_s22, %s282_s3  ;;  %p288_p2 = scmp.lt.s32.totalorder %s282_s3, %s282_s3 }
   0xb   :  { %239 = vmatmul.mubr.msk.f32.vlgmr.msra.gmra.mrb[0].mxu0 %vm33_vm1, %v21_v16  ;;  %272 = vmatprep.subr.bf16.mxu1 %v306_v3 }
   0xc   :  { %p289_p3 = por %p288_p2, %p287_p1 }
   0xe   :  { %274 = vmatpush3.bf16.msra.mxu1 %v273_v17  ;;  %p290_p4 = pnand %p289_p3, %p283_p0 }
   0xf   :  { %275 = vmatprep.subr.bf16.mxu1 %v306_v3 }
  0x12   :  { %277 = vmatpush3.bf16.msra.mxu1 %v276_v20 }
  0xde   :  { %v103_v22 = vpop.f32.mrb[0].mxu0 }
  0xdf   :  { %v104_v23 = vadd.f32 %v212_v21, %v103_v22  ;;  %v240_v24 = vpop.f32.mrb[1].mxu0 }
  0xe1   :  { %v107_v25 = vmax.f32 %v104_v23, 0.0 }
  0xe3   :  { %258 = vmatmul.mubr.msk.f32.vlgmr.msra.gmra.mrb[0].mxu1 %vm123_vm2, %v107_v25 }
 0x1b6   :  { %v193_v27 = vpop.f32.mrb[0].mxu1 }
 0x1b7   :  { %v194_v28 = vadd.f32 %v214_v26, %v193_v27  ;;  %v259_v29 = vpop.f32.mrb[1].mxu1 }
 0x1b9   :  { %197 = vst.msk [vmem:[#allocation2] sm:$0xff] %vm33_vm1, %v194_v28 }
 0x1ba   :  { %293 = shalt.err (!%p290_p4)
}
 0x1bb   :  { %s294_s24 = scalar_lea.hbm %s404_s5, 128 }
 0x1bc   :  { %p295_p5 = scmp.ne.s32.totalorder %s404_s5, %s294_s24  ;;  %p298_p6 = scmp.lt.u32.totalorder %s294_s24, %s404_s5 }
 0x1be   :  { %p300_p7 = pnand %p298_p6, %p295_p5 }
 0x1c0   :  { %303 = shalt.err (!%p300_p7)
}
 0x1c1   :  { %207 = dma.vmem_to_hbm [thread:$0]  %s205_s22, 128, %s404_s5, [#allocation3]  }
 0x1c2   :  { %304 = dma.done.wait [#allocation3], 128  }
 0x1c3   :  { %305 = vsyncadd [#allocation3], 4294967168 }
 0x1c4   :  { %211 = vsyncpa [#allocation3], 1 }

</bundles_post_ra>
